<compile_context>
chip_gen: v7x
topology: tpu7x:2x2x1
jax: 0.10.0
libtpu: 0.0.40
codegen_flags: <defaults>
</compile_context>

<pallas_src>
import jax
import jax.numpy as jnp
from jax.experimental import pallas as pl

# Small, module-consistent sizes.
EMBED = 32          # embed_size (model_dim)
HEADS = 4           # heads
HEAD_DIM = EMBED // HEADS
FWD_EXP = 4         # forward_expansion
FF = FWD_EXP * EMBED
SEQ = 8
BATCH = 2
NUM_LAYERS = 2
LN_EPS = 1e-5       # nn.LayerNorm default

# Shifts used to build the head mask without integer division (power-of-two).
assert HEAD_DIM & (HEAD_DIM - 1) == 0 and SEQ & (SEQ - 1) == 0
_HD_SHIFT = HEAD_DIM.bit_length() - 1
_SEQ_SHIFT = SEQ.bit_length() - 1

# Row layout of the packed small-parameter slab (one (8, 128) f32 VMEM tile).
ROW_BQKV, ROW_BF1, ROW_BO, ROW_BF2, ROW_G1, ROW_B1, ROW_G2, ROW_B2 = range(8)
SLAB_ROWS, SLAB_LANES = 8, 128
assert 3 * EMBED <= SLAB_LANES and FF <= SLAB_LANES


def _layernorm(x, gamma, beta):
    mean = jnp.mean(x, axis=-1, keepdims=True)
    var = jnp.mean((x - mean) ** 2, axis=-1, keepdims=True)
    return (x - mean) * jax.lax.rsqrt(var + LN_EPS) * gamma + beta


def transformer_block_kernel(
    x_ref,      # (B*S, D)
    wqkv_ref,   # (D, 3D)   packed [wq | wk | wv]
    wo_ref,     # (D, D)
    wf1_ref,    # (D, FF)
    wf2_ref,    # (FF, D)
    slab_ref,   # (8, 128)  packed small params (biases + LayerNorm affine)
    out_ref,    # (B*S, D)
):
    x = x_ref[...].astype(jnp.float32)                                   # (BS, D)

    # Packed small parameters; every lane slice starts at lane 0.
    bqkv = slab_ref[ROW_BQKV:ROW_BQKV + 1, 0:3 * EMBED]                  # (1, 3D)
    bf1 = slab_ref[ROW_BF1:ROW_BF1 + 1, 0:FF]                            # (1, FF)
    bo = slab_ref[ROW_BO:ROW_BO + 1, 0:EMBED]                            # (1, D)
    bf2 = slab_ref[ROW_BF2:ROW_BF2 + 1, 0:EMBED]
    g1 = slab_ref[ROW_G1:ROW_G1 + 1, 0:EMBED]
    b1 = slab_ref[ROW_B1:ROW_B1 + 1, 0:EMBED]
    g2 = slab_ref[ROW_G2:ROW_G2 + 1, 0:EMBED]
    b2 = slab_ref[ROW_B2:ROW_B2 + 1, 0:EMBED]

    # ---- QKV projection: one lane-dense matmul over the whole batch. ----
    qkv = jnp.dot(x, wqkv_ref[...], preferred_element_type=jnp.float32) + bqkv
    qkv3 = qkv.reshape(BATCH, SEQ, 3 * EMBED)      # leading-dim split, layout-free
    # D < 128, so any q/k/v split moves lanes; the plain slice is the form
    # Mosaic lowers natively (a lane-dim reshape would be a full relayout).
    q = qkv3[:, :, 0 * EMBED:1 * EMBED]                                  # (B, S, D)
    k = qkv3[:, :, 1 * EMBED:2 * EMBED]                                  # (B, S, D)
    v = qkv3[:, :, 2 * EMBED:3 * EMBED]                                  # (B, S, D)

    # ---- Batched multi-head attention (no per-head loop, no VMEM scratch). ----
    # head_mask[h*S + s, c] = 1  iff column c belongs to head h.
    row = jax.lax.broadcasted_iota(jnp.int32, (HEADS * SEQ, EMBED), 0)
    col = jax.lax.broadcasted_iota(jnp.int32, (HEADS * SEQ, EMBED), 1)
    head_mask = jnp.where((col >> _HD_SHIFT) == (row >> _SEQ_SHIFT), 1.0, 0.0)

    # Head-tiled, head-masked Q: rows ordered (head, query) inside each batch.
    q_hs = jnp.broadcast_to(q[:, None, :, :], (BATCH, HEADS, SEQ, EMBED))
    q_hs = q_hs.reshape(BATCH, HEADS * SEQ, EMBED) * head_mask[None, :, :]

    # Reference scales scores by sqrt(model_dim), NOT sqrt(head_dim).
    scale = 1.0 / (EMBED ** 0.5)
    s = jnp.einsum('bqd,bkd->bqk', q_hs, k,
                   preferred_element_type=jnp.float32) * scale           # (B, H*S, S)
    # mask is None in Encoder.forward -> no additive mask term.
    s = s - jnp.max(s, axis=-1, keepdims=True)
    e = jnp.exp(s)
    # Approximate reciprocal runs on the EUP slot (VALU-free); ~1e-4 relative
    # error, fine for inference.  Use approx=False for strict parity.
    attn = e * pl.reciprocal(jnp.sum(e, axis=-1, keepdims=True), approx=True)

    ctx_hs = jnp.einsum('bqk,bkd->bqd', attn, v,
                        preferred_element_type=jnp.float32)              # (B, H*S, D)
    # Re-assemble heads: keep each row block's own head columns (the rest are
    # exact zeros) and fold the H row blocks with sublane-aligned adds.
    ctx_hs = ctx_hs * head_mask[None, :, :]
    context = ctx_hs[:, 0:SEQ, :]
    for h in range(1, HEADS):                      # HEADS-1 vector adds, no matmuls
        context = context + ctx_hs[:, h * SEQ:(h + 1) * SEQ, :]
    context = context.reshape(BATCH * SEQ, EMBED)                        # (BS, D)

    # ---- Output projection + residual + LayerNorm. ----
    attn_out = jnp.dot(context, wo_ref[...],
                       preferred_element_type=jnp.float32) + bo
    # o_drop / self.dropout are identity at inference.
    x1 = _layernorm(attn_out + x, g1, b1)

    # ---- FFN (Linear -> ReLU -> Linear) + residual + LayerNorm. ----
    h1 = jnp.dot(x1, wf1_ref[...], preferred_element_type=jnp.float32) + bf1
    h1 = jnp.maximum(h1, 0.0)
    h2 = jnp.dot(h1, wf2_ref[...], preferred_element_type=jnp.float32) + bf2

    out_ref[...] = _layernorm(h2 + x1, g2, b2).astype(out_ref.dtype)


def _full_spec(arr):
    # Whole array as a single VMEM block (grid-less call).
    return pl.BlockSpec(arr.shape, lambda *_, n=arr.ndim: (0,) * n)


@jax.jit
def transformer_block(x, params):
    """One TransformerBlock forward: (B, S, D) -> (B, S, D). Single grid-less call."""
    B, S, D = x.shape
    x2 = x.reshape(B * S, D)
    out2 = pl.pallas_call(
        transformer_block_kernel,
        out_shape=jax.ShapeDtypeStruct((B * S, D), x.dtype),
        in_specs=[_full_spec(a) for a in (x2, *params)],
        out_specs=_full_spec(x2),
        # Reuse the activation HBM buffer for the output (same shape/dtype;
        # x is fully consumed before the single final store).
        input_output_aliases={0: 0},
    )(x2, *params)
    return out2.reshape(B, S, D)


def init_layer_params(key):
    ks = jax.random.split(key, 12)

    def lin(kw, kb, din, dout):
        w = jax.random.normal(kw, (din, dout), jnp.float32) * 0.05
        b = jax.random.normal(kb, (1, dout), jnp.float32) * 0.05
        return w, b

    wq, bq = lin(ks[0], ks[1], EMBED, EMBED)
    wk, bk = lin(ks[2], ks[3], EMBED, EMBED)
    wv, bv = lin(ks[4], ks[5], EMBED, EMBED)
    wo, bo = lin(ks[6], ks[7], EMBED, EMBED)
    wf1, bf1 = lin(ks[8], ks[9], EMBED, FF)
    wf2, bf2 = lin(ks[10], ks[11], FF, EMBED)

    # Lane-dense packed QKV weight: one (D, 3D) matmul instead of three.
    w_qkv = jnp.concatenate([wq, wk, wv], axis=1)                 # (D, 3D)

    # All sub-(8,128) parameters in one (8, 128) slab -> a single prologue DMA.
    slab = jnp.zeros((SLAB_ROWS, SLAB_LANES), jnp.float32)
    slab = slab.at[ROW_BQKV, 0:3 * EMBED].set(
        jnp.concatenate([bq, bk, bv], axis=1)[0])
    slab = slab.at[ROW_BF1, 0:FF].set(bf1[0])
    slab = slab.at[ROW_BO, 0:EMBED].set(bo[0])
    slab = slab.at[ROW_BF2, 0:EMBED].set(bf2[0])
    slab = slab.at[ROW_G1, 0:EMBED].set(1.0)     # LayerNorm gamma init (ones)
    slab = slab.at[ROW_G2, 0:EMBED].set(1.0)
    # ROW_B1 / ROW_B2 (LayerNorm betas) stay zero.

    return (w_qkv, wo, wf1, wf2, slab)


def encoder_forward(x, layer_params):
    # Faithful to the reference: Encoder.forward feeds the ORIGINAL x to every
    # layer and returns only the LAST layer's output, so layers 0..N-2 are dead
    # compute.  Running only the final layer is bit-identical and ~N x faster.
    return transformer_block(x, layer_params[-1])


if __name__ == "__main__":
    key = jax.random.PRNGKey(0)
    kx, kp = jax.random.split(key)

    x = jax.random.normal(kx, (BATCH, SEQ, EMBED), jnp.float32)
    layer_keys = jax.random.split(kp, NUM_LAYERS)
    layer_params = [init_layer_params(k) for k in layer_keys]

    out = encoder_forward(x, layer_params)
    out = jax.block_until_ready(out)
    assert out.shape == (BATCH, SEQ, EMBED)
    assert jnp.all(jnp.isfinite(out))
    print("KERNEL_OK")
</pallas_src>

<mosaic_0001>
module attributes {stable_mosaic.version = 11 : i64} {
  func.func @transformer_block_kernel(%arg0: memref<16x32xf32, #tpu.memory_space<vmem>>, %arg1: memref<32x96xf32, #tpu.memory_space<vmem>>, %arg2: memref<32x32xf32, #tpu.memory_space<vmem>>, %arg3: memref<32x128xf32, #tpu.memory_space<vmem>>, %arg4: memref<128x32xf32, #tpu.memory_space<vmem>>, %arg5: memref<8x128xf32, #tpu.memory_space<vmem>>, %arg6: memref<16x32xf32, #tpu.memory_space<vmem>>) attributes {dimension_semantics = [], scalar_prefetch = 0 : i64, scratch_operands = 0 : i64, tpu.core_type = #tpu.core_type<tc>} {
    %c0 = arith.constant 0 : index
    %c0_0 = arith.constant 0 : index
    %0 = vector.load %arg0[%c0, %c0_0] : memref<16x32xf32, #tpu.memory_space<vmem>>, vector<16x32xf32>
    %c0_1 = arith.constant 0 : index
    %c0_2 = arith.constant 0 : index
    %1 = vector.load %arg5[%c0_1, %c0_2] : memref<8x128xf32, #tpu.memory_space<vmem>>, vector<1x96xf32>
    %c1 = arith.constant 1 : index
    %c0_3 = arith.constant 0 : index
    %2 = vector.load %arg5[%c1, %c0_3] : memref<8x128xf32, #tpu.memory_space<vmem>>, vector<1x128xf32>
    %c2 = arith.constant 2 : index
    %c0_4 = arith.constant 0 : index
    %3 = vector.load %arg5[%c2, %c0_4] : memref<8x128xf32, #tpu.memory_space<vmem>>, vector<1x32xf32>
    %c3 = arith.constant 3 : index
    %c0_5 = arith.constant 0 : index
    %4 = vector.load %arg5[%c3, %c0_5] : memref<8x128xf32, #tpu.memory_space<vmem>>, vector<1x32xf32>
    %c4 = arith.constant 4 : index
    %c0_6 = arith.constant 0 : index
    %5 = vector.load %arg5[%c4, %c0_6] : memref<8x128xf32, #tpu.memory_space<vmem>>, vector<1x32xf32>
    %c5 = arith.constant 5 : index
    %c0_7 = arith.constant 0 : index
    %6 = vector.load %arg5[%c5, %c0_7] : memref<8x128xf32, #tpu.memory_space<vmem>>, vector<1x32xf32>
    %c6 = arith.constant 6 : index
    %c0_8 = arith.constant 0 : index
    %7 = vector.load %arg5[%c6, %c0_8] : memref<8x128xf32, #tpu.memory_space<vmem>>, vector<1x32xf32>
    %c7 = arith.constant 7 : index
    %c0_9 = arith.constant 0 : index
    %8 = vector.load %arg5[%c7, %c0_9] : memref<8x128xf32, #tpu.memory_space<vmem>>, vector<1x32xf32>
    %c0_10 = arith.constant 0 : index
    %c0_11 = arith.constant 0 : index
    %9 = vector.load %arg1[%c0_10, %c0_11] : memref<32x96xf32, #tpu.memory_space<vmem>>, vector<32x96xf32>
    %cst = arith.constant dense<0.000000e+00> : vector<16x96xf32>
    %10 = tpu.matmul %0, %9, %cst {dimension_numbers = #tpu.dot_dimension_numbers<[1], [0], [0], [1], [0, 0, 1, 1], [], []>} : vector<16x32xf32>, vector<32x96xf32>, vector<16x96xf32> -> vector<16x96xf32>
    %11 = vector.broadcast %1 : vector<1x96xf32> to vector<16x96xf32>
    %12 = arith.addf %10, %11 : vector<16x96xf32>
    %13 = vector.shape_cast %12 : vector<16x96xf32> to vector<2x8x96xf32>
    %14 = vector.extract_strided_slice %13 {offsets = [0, 0, 0], sizes = [2, 8, 32], strides = [1, 1, 1]} : vector<2x8x96xf32> to vector<2x8x32xf32>
    %15 = vector.extract_strided_slice %13 {offsets = [0, 0, 32], sizes = [2, 8, 32], strides = [1, 1, 1]} : vector<2x8x96xf32> to vector<2x8x32xf32>
    %16 = vector.extract_strided_slice %13 {offsets = [0, 0, 64], sizes = [2, 8, 32], strides = [1, 1, 1]} : vector<2x8x96xf32> to vector<2x8x32xf32>
    %17 = tpu.iota {dimensions = array<i32: 0>} : vector<32x32xi32>
    %18 = tpu.iota {dimensions = array<i32: 1>} : vector<32x32xi32>
    %c3_i32 = arith.constant 3 : i32
    %19 = vector.broadcast %c3_i32 : i32 to vector<32x32xi32>
    %20 = arith.shrsi %18, %19 : vector<32x32xi32>
    %c3_i32_12 = arith.constant 3 : i32
    %21 = vector.broadcast %c3_i32_12 : i32 to vector<32x32xi32>
    %22 = arith.shrsi %17, %21 : vector<32x32xi32>
    %23 = arith.cmpi eq, %20, %22 : vector<32x32xi32>
    %cst_13 = arith.constant 1.000000e+00 : f32
    %cst_14 = arith.constant 0.000000e+00 : f32
    %24 = vector.broadcast %cst_13 : f32 to vector<32x32xf32>
    %25 = vector.broadcast %cst_14 : f32 to vector<32x32xf32>
    %26 = arith.select %23, %24, %25 : vector<32x32xi1>, vector<32x32xf32>
    %27 = vector.shape_cast %14 : vector<2x8x32xf32> to vector<2x1x8x32xf32>
    %28 = vector.shape_cast %27 : vector<2x1x8x32xf32> to vector<2x1x8x32xf32>
    %29 = vector.broadcast %28 : vector<2x1x8x32xf32> to vector<2x4x8x32xf32>
    %30 = vector.shape_cast %29 : vector<2x4x8x32xf32> to vector<2x32x32xf32>
    %31 = vector.shape_cast %26 : vector<32x32xf32> to vector<1x32x32xf32>
    %32 = vector.broadcast %31 : vector<1x32x32xf32> to vector<2x32x32xf32>
    %33 = arith.mulf %30, %32 : vector<2x32x32xf32>
    "tpu.trace_start"() <{level = 10 : i32, message = "bqd,bkd->bqk"}> : () -> ()
    %cst_15 = arith.constant dense<0.000000e+00> : vector<2x32x8xf32>
    %34 = tpu.matmul %33, %15, %cst_15 {dimension_numbers = #tpu.dot_dimension_numbers<[2], [2], [1], [1], [0, 0, 0, 1, 1, 1], [0], [0]>} : vector<2x32x32xf32>, vector<2x8x32xf32>, vector<2x32x8xf32> -> vector<2x32x8xf32>
    "tpu.trace_stop"() : () -> ()
    %cst_16 = arith.constant 0.176776692 : f32
    %35 = vector.broadcast %cst_16 : f32 to vector<2x32x8xf32>
    %36 = arith.mulf %34, %35 : vector<2x32x8xf32>
    %cst_17 = arith.constant dense<0xFF800000> : vector<2x32xf32>
    %37 = vector.multi_reduction <maximumf>, %36, %cst_17 [2] : vector<2x32x8xf32> to vector<2x32xf32>
    %38 = vector.shape_cast %37 : vector<2x32xf32> to vector<2x32x1xf32>
    %39 = vector.broadcast %38 : vector<2x32x1xf32> to vector<2x32x8xf32>
    %40 = arith.subf %36, %39 : vector<2x32x8xf32>
    %41 = math.exp %40 : vector<2x32x8xf32>
    %cst_18 = arith.constant dense<0.000000e+00> : vector<2x32xf32>
    %42 = vector.multi_reduction <add>, %41, %cst_18 [2] : vector<2x32x8xf32> to vector<2x32xf32>
    %43 = vector.shape_cast %42 : vector<2x32xf32> to vector<2x32x1xf32>
    %44 = tpu.reciprocal %43 {approx = true} : vector<2x32x1xf32> -> vector<2x32x1xf32>
    %45 = vector.broadcast %44 : vector<2x32x1xf32> to vector<2x32x8xf32>
    %46 = arith.mulf %41, %45 : vector<2x32x8xf32>
    "tpu.trace_start"() <{level = 10 : i32, message = "bqk,bkd->bqd"}> : () -> ()
    %cst_19 = arith.constant dense<0.000000e+00> : vector<2x32x32xf32>
    %47 = tpu.matmul %46, %16, %cst_19 {dimension_numbers = #tpu.dot_dimension_numbers<[2], [1], [1], [2], [0, 0, 0, 1, 1, 2], [0], [0]>} : vector<2x32x8xf32>, vector<2x8x32xf32>, vector<2x32x32xf32> -> vector<2x32x32xf32>
    "tpu.trace_stop"() : () -> ()
    %48 = vector.shape_cast %26 : vector<32x32xf32> to vector<1x32x32xf32>
    %49 = vector.broadcast %48 : vector<1x32x32xf32> to vector<2x32x32xf32>
    %50 = arith.mulf %47, %49 : vector<2x32x32xf32>
    %51 = vector.extract_strided_slice %50 {offsets = [0, 0, 0], sizes = [2, 8, 32], strides = [1, 1, 1]} : vector<2x32x32xf32> to vector<2x8x32xf32>
    %52 = vector.extract_strided_slice %50 {offsets = [0, 8, 0], sizes = [2, 8, 32], strides = [1, 1, 1]} : vector<2x32x32xf32> to vector<2x8x32xf32>
    %53 = arith.addf %51, %52 : vector<2x8x32xf32>
    %54 = vector.extract_strided_slice %50 {offsets = [0, 16, 0], sizes = [2, 8, 32], strides = [1, 1, 1]} : vector<2x32x32xf32> to vector<2x8x32xf32>
    %55 = arith.addf %53, %54 : vector<2x8x32xf32>
    %56 = vector.extract_strided_slice %50 {offsets = [0, 24, 0], sizes = [2, 8, 32], strides = [1, 1, 1]} : vector<2x32x32xf32> to vector<2x8x32xf32>
    %57 = arith.addf %55, %56 : vector<2x8x32xf32>
    %58 = vector.shape_cast %57 : vector<2x8x32xf32> to vector<16x32xf32>
    %c0_20 = arith.constant 0 : index
    %c0_21 = arith.constant 0 : index
    %59 = vector.load %arg2[%c0_20, %c0_21] : memref<32x32xf32, #tpu.memory_space<vmem>>, vector<32x32xf32>
    %cst_22 = arith.constant dense<0.000000e+00> : vector<16x32xf32>
    %60 = tpu.matmul %58, %59, %cst_22 {dimension_numbers = #tpu.dot_dimension_numbers<[1], [0], [0], [1], [0, 0, 1, 1], [], []>} : vector<16x32xf32>, vector<32x32xf32>, vector<16x32xf32> -> vector<16x32xf32>
    %61 = vector.broadcast %3 : vector<1x32xf32> to vector<16x32xf32>
    %62 = arith.addf %60, %61 : vector<16x32xf32>
    %63 = arith.addf %62, %0 : vector<16x32xf32>
    %cst_23 = arith.constant dense<0.000000e+00> : vector<16xf32>
    %64 = vector.multi_reduction <add>, %63, %cst_23 [1] : vector<16x32xf32> to vector<16xf32>
    %65 = vector.shape_cast %64 : vector<16xf32> to vector<16x1xf32>
    %cst_24 = arith.constant 3.200000e+01 : f32
    %66 = vector.broadcast %cst_24 : f32 to vector<16x1xf32>
    %67 = arith.divf %65, %66 : vector<16x1xf32>
    %68 = vector.broadcast %67 : vector<16x1xf32> to vector<16x32xf32>
    %69 = arith.subf %63, %68 : vector<16x32xf32>
    %70 = arith.mulf %69, %69 : vector<16x32xf32>
    %cst_25 = arith.constant dense<0.000000e+00> : vector<16xf32>
    %71 = vector.multi_reduction <add>, %70, %cst_25 [1] : vector<16x32xf32> to vector<16xf32>
    %72 = vector.shape_cast %71 : vector<16xf32> to vector<16x1xf32>
    %cst_26 = arith.constant 3.200000e+01 : f32
    %73 = vector.broadcast %cst_26 : f32 to vector<16x1xf32>
    %74 = arith.divf %72, %73 : vector<16x1xf32>
    %75 = vector.broadcast %67 : vector<16x1xf32> to vector<16x32xf32>
    %76 = arith.subf %63, %75 : vector<16x32xf32>
    %cst_27 = arith.constant 9.99999974E-6 : f32
    %77 = vector.broadcast %cst_27 : f32 to vector<16x1xf32>
    %78 = arith.addf %74, %77 : vector<16x1xf32>
    %79 = math.rsqrt %78 : vector<16x1xf32>
    %80 = vector.broadcast %79 : vector<16x1xf32> to vector<16x32xf32>
    %81 = arith.mulf %76, %80 : vector<16x32xf32>
    %82 = vector.broadcast %5 : vector<1x32xf32> to vector<16x32xf32>
    %83 = arith.mulf %81, %82 : vector<16x32xf32>
    %84 = vector.broadcast %6 : vector<1x32xf32> to vector<16x32xf32>
    %85 = arith.addf %83, %84 : vector<16x32xf32>
    %c0_28 = arith.constant 0 : index
    %c0_29 = arith.constant 0 : index
    %86 = vector.load %arg3[%c0_28, %c0_29] : memref<32x128xf32, #tpu.memory_space<vmem>>, vector<32x128xf32>
    %cst_30 = arith.constant dense<0.000000e+00> : vector<16x128xf32>
    %87 = tpu.matmul %85, %86, %cst_30 {dimension_numbers = #tpu.dot_dimension_numbers<[1], [0], [0], [1], [0, 0, 1, 1], [], []>} : vector<16x32xf32>, vector<32x128xf32>, vector<16x128xf32> -> vector<16x128xf32>
    %88 = vector.broadcast %2 : vector<1x128xf32> to vector<16x128xf32>
    %89 = arith.addf %87, %88 : vector<16x128xf32>
    %cst_31 = arith.constant 0.000000e+00 : f32
    %90 = vector.broadcast %cst_31 : f32 to vector<16x128xf32>
    %91 = arith.maximumf %89, %90 : vector<16x128xf32>
    %c0_32 = arith.constant 0 : index
    %c0_33 = arith.constant 0 : index
    %92 = vector.load %arg4[%c0_32, %c0_33] : memref<128x32xf32, #tpu.memory_space<vmem>>, vector<128x32xf32>
    %cst_34 = arith.constant dense<0.000000e+00> : vector<16x32xf32>
    %93 = tpu.matmul %91, %92, %cst_34 {dimension_numbers = #tpu.dot_dimension_numbers<[1], [0], [0], [1], [0, 0, 1, 1], [], []>} : vector<16x128xf32>, vector<128x32xf32>, vector<16x32xf32> -> vector<16x32xf32>
    %94 = vector.broadcast %4 : vector<1x32xf32> to vector<16x32xf32>
    %95 = arith.addf %93, %94 : vector<16x32xf32>
    %96 = arith.addf %95, %85 : vector<16x32xf32>
    %cst_35 = arith.constant dense<0.000000e+00> : vector<16xf32>
    %97 = vector.multi_reduction <add>, %96, %cst_35 [1] : vector<16x32xf32> to vector<16xf32>
    %98 = vector.shape_cast %97 : vector<16xf32> to vector<16x1xf32>
    %cst_36 = arith.constant 3.200000e+01 : f32
    %99 = vector.broadcast %cst_36 : f32 to vector<16x1xf32>
    %100 = arith.divf %98, %99 : vector<16x1xf32>
    %101 = vector.broadcast %100 : vector<16x1xf32> to vector<16x32xf32>
    %102 = arith.subf %96, %101 : vector<16x32xf32>
    %103 = arith.mulf %102, %102 : vector<16x32xf32>
    %cst_37 = arith.constant dense<0.000000e+00> : vector<16xf32>
    %104 = vector.multi_reduction <add>, %103, %cst_37 [1] : vector<16x32xf32> to vector<16xf32>
    %105 = vector.shape_cast %104 : vector<16xf32> to vector<16x1xf32>
    %cst_38 = arith.constant 3.200000e+01 : f32
    %106 = vector.broadcast %cst_38 : f32 to vector<16x1xf32>
    %107 = arith.divf %105, %106 : vector<16x1xf32>
    %108 = vector.broadcast %100 : vector<16x1xf32> to vector<16x32xf32>
    %109 = arith.subf %96, %108 : vector<16x32xf32>
    %cst_39 = arith.constant 9.99999974E-6 : f32
    %110 = vector.broadcast %cst_39 : f32 to vector<16x1xf32>
    %111 = arith.addf %107, %110 : vector<16x1xf32>
    %112 = math.rsqrt %111 : vector<16x1xf32>
    %113 = vector.broadcast %112 : vector<16x1xf32> to vector<16x32xf32>
    %114 = arith.mulf %109, %113 : vector<16x32xf32>
    %115 = vector.broadcast %7 : vector<1x32xf32> to vector<16x32xf32>
    %116 = arith.mulf %114, %115 : vector<16x32xf32>
    %117 = vector.broadcast %8 : vector<1x32xf32> to vector<16x32xf32>
    %118 = arith.addf %116, %117 : vector<16x32xf32>
    %c0_40 = arith.constant 0 : index
    %c0_41 = arith.constant 0 : index
    %119 = vector.load %arg6[%c0_40, %c0_41] : memref<16x32xf32, #tpu.memory_space<vmem>>, vector<16x32xf32>
    tpu.vector_store %arg6[%c0_40, %c0_41], %118 {strides = array<i32>} : memref<16x32xf32, #tpu.memory_space<vmem>>, vector<16x32xf32>,
    return
  }
}

</mosaic_0001>

<bundles_post_ra>
// kernel: transformer_block.1
= control target key start
LH: loop header
LB: loop body
LE: loop exit
PB: predicated region body
PF: predicated region fallthrough
CT: control target
= control target key end

     0   :  { %vm41_vm0 = vcmask 261120   ;;  %v123_v8 = vlaneseq  ;;  %v1315_v18 = vmov 0.0   ;;  %s1316_s9 = smov 96   ;;  %vm363_vm5 = vcmask 64512   ;;  %s1317_s10 = smov 64   ;;  %s1587_s1 = inlined_call_operand.vmem [shape: f32[32,96], index: 1, kind: input, shape index: {}]   ;;  %s1588_s0 = inlined_call_operand.vmem [shape: f32[16,32], index: 0, kind: input, shape index: {}, may-alias: {0,6}]   ;;  %s1589_s5 = inlined_call_operand.vmem [shape: f32[8,128], index: 5, kind: input, shape index: {}]   ;;  %s1590_s2 = inlined_call_operand.vmem [shape: f32[32,32], index: 2, kind: input, shape index: {}]   ;;  %s1591_s3 = inlined_call_operand.vmem [shape: f32[32,128], index: 3, kind: input, shape index: {}]   ;;  %s1592_s4 = inlined_call_operand.vmem [shape: f32[128,32], index: 4, kind: input, shape index: {}]   ;;  %s1593_s6 = inlined_call_operand.vmem [shape: f32[16,32], index: 6, kind: output, shape index: {}, may-alias: {0,6}]  }
   0x1   :  { %v33_v0 = vld [vmem:[%s1587_s1] sm:$0xff]  ;;  %v34_v1 = vld [vmem:[%s1587_s1 + $0x8] sm:$0xff]  ;;  %v35_v2 = vld [vmem:[%s1587_s1 + $0x10] sm:$0xff] }
   0x2   :  { %v1216_v3 = vpack.c.bf16 %v34_v1, %v33_v0  ;;  %v36_v4 = vld [vmem:[%s1587_s1 + $0x18] sm:$0xff]  ;;  %v1368_v5 = vld [vmem:[%s1588_s0] sm:$0xff]  ;;  %v1375_v7 = vld [vmem:[%s1588_s0 + $0x8] sm:$0xff]  ;;  %v124_v9 = vshrl.u32 %v123_v8, 7  ;;  %v129_v10 = vand.u32 127, %v123_v8 }
   0x3   :  { %v1220_v6 = vpack.c.bf16 %v36_v4, %v35_v2  ;;  %1124 = vmatprep.mubr.msk.f32.mxu0 %vm41_vm0, %v1368_v5  ;;  %v1028_v23 = vld [vmem:[%s1589_s5] ss:$0 sm:$0xff] }
   0x4   :  { %1217 = vmatprep.subr.bf16.mxu0 %v1216_v3  ;;  %v125_v11 = vadd.s32 8, %v124_v9  ;;  %v126_v12 = vadd.s32 16, %v124_v9  ;;  %v127_v13 = vadd.s32 24, %v124_v9  ;;  %v130_v14 = vshra.s32 %v129_v10, 3 }
   0x5   :  { %1219 = vmatpush3.bf16.msra.mxu0 %v1216_v3  ;;  %v131_v22 = vshra.s32 %v124_v9, 3 }
   0x6   :  { %1221 = vmatprep.subr.bf16.mxu0 %v1220_v6  ;;  %v132_v15 = vshra.s32 %v125_v11, 3  ;;  %v133_v16 = vshra.s32 %v126_v12, 3  ;;  %v134_v17 = vshra.s32 %v127_v13, 3 }
   0x7   :  { %vm135_vm4 = vcmp.eq.s32.totalorder %v130_v14, %v131_v22 }
   0x8   :  { %vm136_vm1 = vcmp.eq.s32.totalorder %v130_v14, %v132_v15  ;;  %vm137_vm2 = vcmp.eq.s32.totalorder %v130_v14, %v133_v16  ;;  %vm138_vm3 = vcmp.eq.s32.totalorder %v130_v14, %v134_v17  ;;  %v1388_v26 = vsel %vm135_vm4, 1.0, %v1315_v18 }
   0x9   :  { %1223 = vmatpush3.bf16.msra.mxu0 %v1220_v6  ;;  %v1379_v19 = vsel %vm136_vm1, 1.0, %v1315_v18  ;;  %v1381_v20 = vsel %vm137_vm2, 1.0, %v1315_v18  ;;  %v1383_v21 = vsel %vm138_vm3, 1.0, %v1315_v18 }
   0xc   :  { %1125 = vmatmul.mubr.msk.f32.vlgmr.msra.gmra.mrb[0].mxu0 %vm41_vm0, %v1375_v7 }
  0xdf   :  { %v1126_v24 = vpop.f32.mrb[0].mxu0 }
  0xe0   :  { %v114_v25 = vpop.f32.mrb[1].mxu0  ;;  %v1395_v29 = vadd.f32 %v1126_v24, %v1028_v23 }
  0xe1   :  { %v1390_v27 = vadd.f32 %v1028_v23, %v114_v25 }
  0xe2   :  { %v147_v35 = vmul.f32 %v1388_v26, %v1395_v29  ;;  %v148_v36 = vmul.f32 %v1379_v19, %v1395_v29  ;;  %v149_v37 = vmul.f32 %v1381_v20, %v1395_v29  ;;  %v150_v38 = vmul.f32 %v1383_v21, %v1395_v29 }
  0xe3   :  { %152 = vrot.lane.b32.xlu0 %v1390_v27, %s1316_s9  ;;  %v143_v28 = vmul.f32 %v1388_v26, %v1390_v27  ;;  %v144_v31 = vmul.f32 %v1379_v19, %v1390_v27  ;;  %v145_v33 = vmul.f32 %v1381_v20, %v1390_v27  ;;  %v146_v34 = vmul.f32 %v1383_v21, %v1390_v27 }
  0xe5   :  { %1129 = vmatprep.mubr.msk.f32.mxu0 %vm41_vm0, %v143_v28 }
  0xe7   :  { %254 = vrot.lane.b32.xlu0 %v1395_v29, %s1316_s9 }
 0x155   :  { %v153_v30 = vpop.permute.xlu0 %152 }
 0x156   :  { %1127 = vmatprep.subr.msk.mxu0 %vm41_vm0, %v153_v30 }
 0x157   :  { %1128 = vmatpush3.xpose.msk.msra.mxu0 %vm41_vm0, %v153_v30 }
 0x159   :  { %v255_v32 = vpop.permute.xlu0 %254 }
 0x15a   :  { %1130 = vmatmul.mubr.msk.f32.vlgmr.msra.gmra.mrb[2].mxu0 %vm41_vm0, %v144_v31  ;;  %1135 = vmatprep.subr.msk.mxu0 %vm41_vm0, %v255_v32 }
 0x15b   :  { %1132 = vmatprep.mubr.msk.f32.mxu0 %vm41_vm0, %v145_v33  ;;  %1136 = vmatpush3.xpose.msk.msra.mxu0 %vm41_vm0, %v255_v32 }
 0x15e   :  { %1133 = vmatmul.mubr.msk.f32.gmra.mrb[4].mxu0 %vm41_vm0, %v146_v34 }
 0x15f   :  { %1137 = vmatprep.mubr.msk.f32.mxu0 %vm41_vm0, %v147_v35 }
 0x162   :  { %1138 = vmatmul.mubr.msk.f32.vlgmr.msra.gmra.mrb[6].mxu0 %vm41_vm0, %v148_v36 }
 0x163   :  { %1140 = vmatprep.mubr.msk.f32.mxu0 %vm41_vm0, %v149_v37 }
 0x166   :  { %1141 = vmatmul.mubr.msk.f32.gmra.mrb[8].mxu0 %vm41_vm0, %v150_v38 }
 0x22d   :  { %v1131_v39 = vpop.f32.mrb[2].mxu0 }
 0x22e   :  { %v356_v40 = vmul.f32 0.17677669, %v1131_v39  ;;  %v234_v41 = vpop.f32.mrb[3].mxu0 }
 0x22f   :  { %v355_v42 = vmul.f32 0.17677669, %v234_v41 }
 0x230   :  { %v367_v43 = vsel %vm363_vm5, %v356_v40, -inf }
 0x231   :  { %368 = vmax.xlane.f32.xlu1 %v367_v43  ;;  %v1134_v44 = vpop.f32.mrb[4].mxu0  ;;  %v364_v46 = vsel %vm363_vm5, %v355_v42, -inf }
 0x232   :  { %v244_v45 = vpop.f32.mrb[5].mxu0  ;;  %v358_v56 = vmul.f32 0.17677669, %v1134_v44 }
 0x233   :  { %v357_v51 = vmul.f32 0.17677669, %v244_v45 }
 0x234   :  { %v373_v59 = vsel %vm363_vm5, %v358_v56, -inf }
 0x235   :  { %365 = vmax.xlane.f32.xlu1 %v364_v46  ;;  %v1139_v47 = vpop.f32.mrb[6].mxu0  ;;  %v370_v57 = vsel %vm363_vm5, %v357_v51, -inf }
 0x236   :  { %v360_v48 = vmul.f32 0.17677669, %v1139_v47  ;;  %v336_v49 = vpop.f32.mrb[7].mxu0 }
 0x237   :  { %v359_v50 = vmul.f32 0.17677669, %v336_v49 }
 0x238   :  { %v379_v52 = vsel %vm363_vm5, %v360_v48, -inf }
 0x239   :  { %380 = vmax.xlane.f32.xlu1 %v379_v52  ;;  %v1142_v53 = vpop.f32.mrb[8].mxu0  ;;  %v376_v54 = vsel %vm363_vm5, %v359_v50, -inf }
 0x23a   :  { %377 = vmax.xlane.f32.xlu0 %v376_v54  ;;  %v346_v55 = vpop.f32.mrb[9].mxu0  ;;  %v362_v60 = vmul.f32 0.17677669, %v1142_v53 }
 0x23b   :  { %v361_v58 = vmul.f32 0.17677669, %v346_v55 }
 0x23c   :  { %v385_v62 = vsel %vm363_vm5, %v362_v60, -inf }
 0x23d   :  { %371 = vmax.xlane.f32.xlu1 %v370_v57  ;;  %v382_v61 = vsel %vm363_vm5, %v361_v58, -inf }
 0x241   :  { %374 = vmax.xlane.f32.xlu1 %v373_v59 }
 0x245   :  { %383 = vmax.xlane.f32.xlu1 %v382_v61 }
 0x249   :  { %386 = vmax.xlane.f32.xlu1 %v385_v62 }
 0x2be   :  { %v369_v63 = vpop.xlane.xlu1 %368 }
 0x2bf   :  { %v389_v0 = vsub.f32 %v356_v40, %v369_v63 }
 0x2c1   :  { %v398_v1 = vmul.f32 1.442695, %v389_v0 }
 0x2c2   :  { %v366_v2 = vpop.xlane.xlu1 %365 }
 0x2c3   :  { %1275 = vpow2.f32 %v398_v1  ;;  %v388_v3 = vsub.f32 %v355_v42, %v366_v2 }
 0x2c5   :  { %v396_v4 = vmul.f32 1.442695, %v388_v3 }
 0x2c6   :  { %v381_v6 = vpop.xlane.xlu1 %380 }
 0x2c7   :  { %1277 = vpow2.f32 %v396_v4  ;;  %v378_v8 = vpop.xlane.xlu0 %377  ;;  %v393_v13 = vsub.f32 %v360_v48, %v381_v6 }
 0x2c8   :  { %v392_v9 = vsub.f32 %v359_v50, %v378_v8 }
 0x2c9   :  { %v406_v23 = vmul.f32 1.442695, %v393_v13  ;;  %v669_v13 = vld [vmem:[%s1590_s2 + $0x18] sm:$0xff] }
 0x2ca   :  { %v372_v10 = vpop.xlane.xlu1 %371  ;;  %v404_v14 = vmul.f32 1.442695, %v392_v9  ;;  %v666_v9 = vld [vmem:[%s1590_s2] sm:$0xff] }
 0x2cb   :  { %v390_v11 = vsub.f32 %v357_v51, %v372_v10  ;;  %v667_v10 = vld [vmem:[%s1590_s2 + $0x8] sm:$0xff] }
 0x2cd   :  { %v1432_v12 = vpop.eup %1275  ;;  %v400_v15 = vmul.f32 1.442695, %v390_v11  ;;  %v1224_v11 = vpack.c.bf16 %v667_v10, %v666_v9  ;;  %v895_v10 = vld [vmem:[%s1592_s4 + $0x40] sm:$0xff] }
 0x2ce   :  { %v375_v16 = vpop.xlane.xlu1 %374  ;;  %v415_v17 = vsel %vm363_vm5, %v1432_v12, 0.0 }
 0x2cf   :  { %1279 = vpow2.f32 %v400_v15  ;;  %v391_v18 = vsub.f32 %v358_v56, %v375_v16  ;;  %416 = vadd.xlane.f32.xlu1 %v415_v17 }
 0x2d0   :  { %1281 = vpow2.f32 %v404_v14 }
 0x2d1   :  { %v1278_v22 = vpop.eup %1277  ;;  %v402_v24 = vmul.f32 1.442695, %v391_v18 }
 0x2d2   :  { %v384_v25 = vpop.xlane.xlu1 %383  ;;  %v412_v28 = vsel %vm363_vm5, %v1278_v22, 0.0 }
 0x2d3   :  { %1283 = vpow2.f32 %v402_v24  ;;  %v394_v30 = vsub.f32 %v361_v58, %v384_v25  ;;  %413 = vadd.xlane.f32.xlu1 %v412_v28 }
 0x2d4   :  { %1285 = vpow2.f32 %v406_v23 }
 0x2d5   :  { %v408_v31 = vmul.f32 1.442695, %v394_v30 }
 0x2d6   :  { %v387_v32 = vpop.xlane.xlu1 %386 }
 0x2d7   :  { %1287 = vpow2.f32 %v408_v31  ;;  %v395_v33 = vsub.f32 %v362_v60, %v387_v32 }
 0x2d9   :  { %v1280_v34 = vpop.eup %1279  ;;  %v410_v35 = vmul.f32 1.442695, %v395_v33 }
 0x2da   :  { %v418_v36 = vsel %vm363_vm5, %v1280_v34, 0.0  ;;  %v1282_v37 = vpop.eup %1281 }
 0x2db   :  { %1289 = vpow2.f32 %v410_v35  ;;  %419 = vadd.xlane.f32.xlu1 %v418_v36  ;;  %v424_v40 = vsel %vm363_vm5, %v1282_v37, 0.0 }
 0x2dd   :  { %v1284_v38 = vpop.eup %1283 }
 0x2de   :  { %v421_v39 = vsel %vm363_vm5, %v1284_v38, 0.0  ;;  %v1286_v41 = vpop.eup %1285 }
 0x2df   :  { %422 = vadd.xlane.f32.xlu0 %v421_v39  ;;  %425 = vadd.xlane.f32.xlu1 %v424_v40  ;;  %v427_v43 = vsel %vm363_vm5, %v1286_v41, 0.0 }
 0x2e1   :  { %v1288_v42 = vpop.eup %1287 }
 0x2e2   :  { %v430_v44 = vsel %vm363_vm5, %v1288_v42, 0.0 }
 0x2e3   :  { %428 = vadd.xlane.f32.xlu0 %v427_v43  ;;  %431 = vadd.xlane.f32.xlu1 %v430_v44 }
 0x2e5   :  { %v1290_v45 = vpop.eup %1289 }
 0x2e6   :  { %v433_v46 = vsel %vm363_vm5, %v1290_v45, 0.0 }
 0x2e7   :  { %434 = vadd.xlane.f32.xlu0 %v433_v46 }
 0x2f4   :  { %452 = vrot.lane.b32.xlu1 %v1390_v27, %s1317_s10 }
 0x2fd   :  { %552 = vrot.lane.b32.xlu0 %v1395_v29, %s1317_s10 }
 0x35c   :  { %v417_v47 = vpop.xlane.xlu1 %416 }
 0x360   :  { %v414_v48 = vpop.xlane.xlu1 %413 }
 0x361   :  { %1291 = vrcp.f32 %v414_v48 }
 0x362   :  { %1293 = vrcp.f32 %v417_v47 }
 0x368   :  { %v420_v49 = vpop.xlane.xlu1 %419 }
 0x369   :  { %1295 = vrcp.f32 %v420_v49 }
 0x36b   :  { %v1292_v50 = vpop.eup %1291 }
 0x36c   :  { %v423_v51 = vpop.xlane.xlu0 %422  ;;  %v426_v52 = vpop.xlane.xlu1 %425  ;;  %v444_v53 = vmul.f32 %v1292_v50, %v1278_v22 }
 0x36d   :  { %1297 = vrcp.f32 %v423_v51  ;;  %v1294_v27 = vpop.eup %1293 }
 0x36e   :  { %1299 = vrcp.f32 %v426_v52  ;;  %1145 = vmatprep.mubr.msk.f32.mxu1 %vm363_vm5, %v444_v53  ;;  %v445_v58 = vmul.f32 %v1294_v27, %v1432_v12  ;;  %v668_v12 = vld [vmem:[%s1590_s2 + $0x10] sm:$0xff]  ;;  %v796_v27 = vld [vmem:[%s1591_s3] sm:$0xff] }
 0x36f   :  { %v1228_v14 = vpack.c.bf16 %v669_v13, %v668_v12  ;;  %v897_v13 = vld [vmem:[%s1592_s4 + $0x50] sm:$0xff] }
 0x370   :  { %v429_v54 = vpop.xlane.xlu0 %428  ;;  %v432_v55 = vpop.xlane.xlu1 %431 }
 0x371   :  { %1301 = vrcp.f32 %v429_v54 }
 0x372   :  { %1303 = vrcp.f32 %v432_v55 }
 0x373   :  { %v1296_v29 = vpop.eup %1295 }
 0x374   :  { %v435_v56 = vpop.xlane.xlu0 %434  ;;  %v453_v57 = vpop.permute.xlu1 %452  ;;  %v446_v59 = vmul.f32 %v1296_v29, %v1280_v34  ;;  %v797_v29 = vld [vmem:[%s1591_s3 + $0x8] sm:$0xff] }
 0x375   :  { %1305 = vrcp.f32 %v435_v56  ;;  %1143 = vmatprep.subr.mxu1 %v453_v57  ;;  %v1232_v56 = vpack.c.bf16 %v797_v29, %v796_v27 }
 0x376   :  { %1144 = vmatpush3.msra.mxu1 %v453_v57  ;;  %v798_v57 = vld [vmem:[%s1591_s3 + $0x10] sm:$0xff] }
 0x377   :  { %v1298_v60 = vpop.eup %1297  ;;  %1146 = vmatmul.mubr.msk.f32.vlgmr.msra.gmra.mrb[0].mxu1 %vm363_vm5, %v445_v58  ;;  %1225 = vmatprep.subr.bf16.mxu1 %v1224_v11  ;;  %v799_v58 = vld [vmem:[%s1591_s3 + $0x18] sm:$0xff] }
 0x378   :  { %v1300_v61 = vpop.eup %1299  ;;  %v553_v62 = vpop.permute.xlu0 %552  ;;  %1148 = vmatprep.mubr.msk.f32.mxu1 %vm363_vm5, %v446_v59  ;;  %v447_v63 = vmul.f32 %v1298_v60, %v1284_v38  ;;  %1227 = vmatpush3.bf16.msra.mxu1 %v1224_v11  ;;  %v1236_v59 = vpack.c.bf16 %v799_v58, %v798_v57  ;;  %v887_v60 = vld [vmem:[%s1592_s4] sm:$0xff]  ;;  %v896_v11 = vld [vmem:[%s1592_s4 + $0x48] sm:$0xff] }
 0x379   :  { %1151 = vmatprep.subr.mxu0 %v553_v62  ;;  %v448_v0 = vmul.f32 %v1300_v61, %v1282_v37  ;;  %1229 = vmatprep.subr.bf16.mxu1 %v1228_v14  ;;  %v888_v61 = vld [vmem:[%s1592_s4 + $0x8] sm:$0xff]  ;;  %v1256_v12 = vpack.c.bf16 %v896_v11, %v895_v10  ;;  %v1059_v10 = vld [vmem:[%s1589_s5 + $0x7] ss:$0 sm:$0xff] }
 0x37a   :  { %1152 = vmatpush3.msra.mxu0 %v553_v62  ;;  %v889_v62 = vld [vmem:[%s1592_s4 + $0x10] sm:$0xff] }
 0x37b   :  { %v1302_v1 = vpop.eup %1301  ;;  %1153 = vmatprep.mubr.msk.f32.mxu0 %vm363_vm5, %v448_v0  ;;  %1149 = vmatmul.mubr.msk.f32.gmra.mrb[2].mxu1 %vm363_vm5, %v447_v63  ;;  %v1240_v63 = vpack.c.bf16 %v888_v61, %v887_v60  ;;  %v890_v0 = vld [vmem:[%s1592_s4 + $0x18] sm:$0xff] }
 0x37c   :  { %v1304_v2 = vpop.eup %1303  ;;  %v449_v3 = vmul.f32 %v1302_v1, %v1286_v41  ;;  %1231 = vmatpush3.bf16.msra.mxu1 %v1228_v14  ;;  %1233 = vmatprep.subr.bf16.mxu0 %v1232_v56  ;;  %v1244_v1 = vpack.c.bf16 %v890_v0, %v889_v62  ;;  %v898_v14 = vld [vmem:[%s1592_s4 + $0x58] sm:$0xff] }
 0x37d   :  { %v450_v4 = vmul.f32 %v1304_v2, %v1288_v42  ;;  %v891_v2 = vld [vmem:[%s1592_s4 + $0x20] sm:$0xff]  ;;  %1241 = vmatprep.subr.bf16.mxu1 %v1240_v63 }
 0x37e   :  { %1154 = vmatmul.mubr.msk.f32.vlgmr.msra.gmra.mrb[10].mxu0 %vm363_vm5, %v449_v3  ;;  %v892_v3 = vld [vmem:[%s1592_s4 + $0x28] sm:$0xff] }
 0x37f   :  { %v1306_v6 = vpop.eup %1305  ;;  %1156 = vmatprep.mubr.msk.f32.mxu0 %vm363_vm5, %v450_v4  ;;  %1235 = vmatpush3.bf16.msra.mxu0 %v1232_v56  ;;  %v1248_v4 = vpack.c.bf16 %v892_v3, %v891_v2 }
 0x380   :  { %v451_v8 = vmul.f32 %v1306_v6, %v1290_v45  ;;  %1237 = vmatprep.subr.bf16.mxu0 %v1236_v59  ;;  %v893_v6 = vld [vmem:[%s1592_s4 + $0x30] sm:$0xff] }
 0x382   :  { %1157 = vmatmul.mubr.msk.f32.gmra.mrb[12].mxu0 %vm363_vm5, %v451_v8  ;;  %v894_v8 = vld [vmem:[%s1592_s4 + $0x38] sm:$0xff] }
 0x383   :  { %1239 = vmatpush3.bf16.msra.mxu0 %v1236_v59  ;;  %v1252_v9 = vpack.c.bf16 %v894_v8, %v893_v6  ;;  %v1058_v6 = vld [vmem:[%s1589_s5 + $0x6] ss:$0 sm:$0xff] }
 0x44a   :  { %v1147_v15 = vpop.f32.mrb[0].mxu1 }
 0x44b   :  { %v653_v16 = vmul.f32 %v1147_v15, %v1379_v19  ;;  %v533_v17 = vpop.f32.mrb[1].mxu1  ;;  %v1260_v15 = vpack.c.bf16 %v898_v14, %v897_v13 }
 0x44c   :  { %v652_v18 = vmul.f32 %v533_v17, %v1388_v26  ;;  %v900_v17 = vld [vmem:[%s1592_s4 + $0x68] sm:$0xff] }
 0x44e   :  { %v660_v22 = vadd.f32 %v653_v16, %v652_v18  ;;  %v1150_v23 = vpop.f32.mrb[2].mxu1  ;;  %v899_v16 = vld [vmem:[%s1592_s4 + $0x60] sm:$0xff] }
 0x44f   :  { %v543_v24 = vpop.f32.mrb[3].mxu1  ;;  %v655_v30 = vmul.f32 %v1150_v23, %v1383_v21  ;;  %v1264_v18 = vpack.c.bf16 %v900_v17, %v899_v16 }
 0x450   :  { %v654_v25 = vmul.f32 %v543_v24, %v1381_v20 }
 0x451   :  { %v1155_v28 = vpop.f32.mrb[10].mxu0 }
 0x452   :  { %v662_v31 = vadd.f32 %v660_v22, %v654_v25  ;;  %v657_v32 = vmul.f32 %v1155_v28, %v1379_v19  ;;  %v633_v33 = vpop.f32.mrb[11].mxu0  ;;  %v1049_v19 = vld [vmem:[%s1589_s5 + $0x2] ss:$0 sm:$0xff] }
 0x453   :  { %v656_v34 = vmul.f32 %v633_v33, %v1388_v26 }
 0x454   :  { %v664_v35 = vadd.f32 %v662_v31, %v655_v30 }
 0x455   :  { %v661_v36 = vadd.f32 %v657_v32, %v656_v34  ;;  %v1158_v37 = vpop.f32.mrb[12].mxu0  ;;  %v1052_v32 = vld [vmem:[%s1589_s5 + $0x4] ss:$0 sm:$0xff] }
 0x456   :  { %v643_v38 = vpop.f32.mrb[13].mxu0  ;;  %1167 = vmatprep.mubr.msk.f32.mxu1 %vm41_vm0, %v664_v35  ;;  %v659_v40 = vmul.f32 %v1158_v37, %v1383_v21 }
 0x457   :  { %v658_v39 = vmul.f32 %v643_v38, %v1381_v20 }
 0x459   :  { %v663_v41 = vadd.f32 %v661_v36, %v658_v39  ;;  %v1053_v36 = vld [vmem:[%s1589_s5 + $0x5] ss:$0 sm:$0xff] }
 0x45b   :  { %v665_v42 = vadd.f32 %v663_v41, %v659_v40  ;;  %v901_v41 = vld [vmem:[%s1592_s4 + $0x70] sm:$0xff] }
 0x45d   :  { %1168 = vmatmul.mubr.msk.f32.vlgmr.msra.gmra.mrb[4].mxu1 %vm41_vm0, %v665_v42  ;;  %v902_v42 = vld [vmem:[%s1592_s4 + $0x78] sm:$0xff] }
 0x45e   :  { %1243 = vmatpush3.bf16.msra.mxu1 %v1240_v63 }
 0x45f   :  { %1245 = vmatprep.subr.bf16.mxu1 %v1244_v1 }
 0x462   :  { %1247 = vmatpush3.bf16.msra.mxu1 %v1244_v1 }
 0x463   :  { %1249 = vmatprep.subr.bf16.mxu1 %v1248_v4 }
 0x466   :  { %1251 = vmatpush3.bf16.msra.mxu1 %v1248_v4 }
 0x467   :  { %1253 = vmatprep.subr.bf16.mxu1 %v1252_v9 }
 0x46a   :  { %1255 = vmatpush3.bf16.msra.mxu1 %v1252_v9 }
 0x46b   :  { %1257 = vmatprep.subr.bf16.mxu1 %v1256_v12 }
 0x46e   :  { %1259 = vmatpush3.bf16.msra.mxu1 %v1256_v12 }
 0x46f   :  { %1261 = vmatprep.subr.bf16.mxu1 %v1260_v15 }
 0x472   :  { %1263 = vmatpush3.bf16.msra.mxu1 %v1260_v15 }
 0x473   :  { %1265 = vmatprep.subr.bf16.mxu1 %v1264_v18 }
 0x476   :  { %1267 = vmatpush3.bf16.msra.mxu1 %v1264_v18 }
 0x530   :  { %v1169_v43 = vpop.f32.mrb[4].mxu1 }
 0x531   :  { %v752_v26 = vadd.f32 %v1169_v43, %v1049_v19  ;;  %v746_v44 = vpop.f32.mrb[5].mxu1  ;;  %v1054_v43 = vld [vmem:[%s1589_s5 + $0x1] ss:$0 sm:$0xff] }
 0x532   :  { %v747_v45 = vadd.f32 %v1049_v19, %v746_v44  ;;  %v1268_v19 = vpack.c.bf16 %v902_v42, %v901_v41 }
 0x533   :  { %v756_v46 = vadd.f32 %v752_v26, %v1375_v7 }
 0x534   :  { %v755_v47 = vadd.f32 %v747_v45, %v1368_v5  ;;  %1269 = vmatprep.subr.bf16.mxu1 %v1268_v19 }
 0x535   :  { %v760_v20 = vsel %vm41_vm0, %v756_v46, 0.0  ;;  %1271 = vmatpush3.bf16.msra.mxu1 %v1268_v19 }
 0x536   :  { %761 = vadd.xlane.f32.xlu0 %v760_v20  ;;  %v757_v21 = vsel %vm41_vm0, %v755_v47, 0.0 }
 0x537   :  { %758 = vadd.xlane.f32.xlu1 %v757_v21  ;;  %v1057_v21 = vld [vmem:[%s1589_s5 + $0x3] ss:$0 sm:$0xff] }
 0x5c3   :  { %v762_v48 = vpop.xlane.xlu0 %761 }
 0x5c4   :  { %v765_v49 = vmul.f32 0.03125, %v762_v48  ;;  %v759_v50 = vpop.xlane.xlu1 %758 }
 0x5c5   :  { %v764_v51 = vmul.f32 0.03125, %v759_v50 }
 0x5c6   :  { %v1483_v52 = vsub.f32 %v756_v46, %v765_v49 }
 0x5c7   :  { %v1485_v53 = vsub.f32 %v755_v47, %v764_v51 }
 0x5c8   :  { %v769_v54 = vmul.f32 %v1483_v52, %v1483_v52 }
 0x5c9   :  { %v768_v5 = vmul.f32 %v1485_v53, %v1485_v53 }
 0x5ca   :  { %v773_v7 = vsel %vm41_vm0, %v769_v54, 0.0 }
 0x5cb   :  { %774 = vadd.xlane.f32.xlu0 %v773_v7  ;;  %v770_v55 = vsel %vm41_vm0, %v768_v5, 0.0 }
 0x5cc   :  { %771 = vadd.xlane.f32.xlu1 %v770_v55 }
 0x658   :  { %v775_v22 = vpop.xlane.xlu0 %774 }
 0x659   :  { %v777_v23 = vmul.f32 0.03125, %v775_v22  ;;  %v772_v24 = vpop.xlane.xlu1 %771 }
 0x65a   :  { %v776_v25 = vmul.f32 0.03125, %v772_v24 }
 0x65b   :  { %v779_v28 = vadd.f32 1e-05, %v777_v23 }
 0x65c   :  { %v778_v30 = vadd.f32 1e-05, %v776_v25 }
 0x65d   :  { %1307 = vrsqrt.f32 %v779_v28 }
 0x65e   :  { %1309 = vrsqrt.f32 %v778_v30 }
 0x667   :  { %v1308_v31 = vpop.eup %1307 }
 0x668   :  { %v1310_v33 = vpop.eup %1309  ;;  %v783_v34 = vmul.f32 %v1308_v31, %v1483_v52 }
 0x669   :  { %v782_v35 = vmul.f32 %v1310_v33, %v1485_v53 }
 0x66a   :  { %v789_v37 = vmul.f32 %v1052_v32, %v783_v34 }
 0x66b   :  { %v788_v38 = vmul.f32 %v1052_v32, %v782_v35 }
 0x66c   :  { %v795_v40 = vadd.f32 %v1053_v36, %v789_v37 }
 0x66d   :  { %v794_v39 = vadd.f32 %v1053_v36, %v788_v38 }
 0x66f   :  { %1178 = vmatprep.mubr.msk.f32.mxu0 %vm41_vm0, %v794_v39 }
 0x670   :  { %1179 = vmatmul.mubr.msk.f32.vlgmr.msra.gmra.mrb[14].mxu0 %vm41_vm0, %v795_v40 }
 0x743   :  { %v1180_v26 = vpop.f32.mrb[14].mxu0 }
 0x744   :  { %v882_v44 = vadd.f32 %v1180_v26, %v1054_v43  ;;  %v876_v45 = vpop.f32.mrb[15].mxu0 }
 0x745   :  { %v877_v46 = vadd.f32 %v1054_v43, %v876_v45 }
 0x746   :  { %v886_v20 = vmax.f32 %v882_v44, 0.0 }
 0x747   :  { %v885_v47 = vmax.f32 %v877_v46, 0.0 }
 0x749   :  { %1213 = vmatprep.mubr.f32.mxu1 %v885_v47 }
 0x74a   :  { %1214 = vmatmul.mubr.f32.vlgmr.msra.gmra.mrb[6].mxu1 %v886_v20 }
 0x81d   :  { %v1215_v48 = vpop.f32.mrb[6].mxu1 }
 0x81e   :  { %v979_v49 = vadd.f32 %v1215_v48, %v1057_v21  ;;  %v973_v50 = vpop.f32.mrb[7].mxu1 }
 0x81f   :  { %v974_v51 = vadd.f32 %v1057_v21, %v973_v50 }
 0x820   :  { %v983_v52 = vadd.f32 %v979_v49, %v795_v40 }
 0x821   :  { %v982_v53 = vadd.f32 %v974_v51, %v794_v39 }
 0x822   :  { %v987_v54 = vsel %vm41_vm0, %v983_v52, 0.0 }
 0x823   :  { %988 = vadd.xlane.f32.xlu0 %v987_v54  ;;  %v984_v5 = vsel %vm41_vm0, %v982_v53, 0.0 }
 0x824   :  { %985 = vadd.xlane.f32.xlu1 %v984_v5 }
 0x8b0   :  { %v989_v7 = vpop.xlane.xlu0 %988 }
 0x8b1   :  { %v991_v55 = vmul.f32 0.03125, %v989_v7  ;;  %v986_v27 = vpop.xlane.xlu1 %985 }
 0x8b2   :  { %v990_v29 = vmul.f32 0.03125, %v986_v27 }
 0x8b3   :  { %v993_v56 = vsub.f32 %v983_v52, %v991_v55 }
 0x8b4   :  { %v992_v57 = vsub.f32 %v982_v53, %v990_v29 }
 0x8b5   :  { %v995_v58 = vmul.f32 %v993_v56, %v993_v56 }
 0x8b6   :  { %v994_v59 = vmul.f32 %v992_v57, %v992_v57 }
 0x8b7   :  { %v999_v60 = vsel %vm41_vm0, %v995_v58, 0.0 }
 0x8b8   :  { %1000 = vadd.xlane.f32.xlu0 %v999_v60  ;;  %v996_v61 = vsel %vm41_vm0, %v994_v59, 0.0 }
 0x8b9   :  { %997 = vadd.xlane.f32.xlu1 %v996_v61 }
 0x945   :  { %v1001_v62 = vpop.xlane.xlu0 %1000 }
 0x946   :  { %v1003_v63 = vmul.f32 0.03125, %v1001_v62  ;;  %v998_v0 = vpop.xlane.xlu1 %997 }
 0x947   :  { %v1002_v1 = vmul.f32 0.03125, %v998_v0 }
 0x948   :  { %v1005_v2 = vadd.f32 1e-05, %v1003_v63 }
 0x949   :  { %v1004_v3 = vadd.f32 1e-05, %v1002_v1 }
 0x94a   :  { %1311 = vrsqrt.f32 %v1005_v2 }
 0x94b   :  { %1313 = vrsqrt.f32 %v1004_v3 }
 0x954   :  { %v1312_v4 = vpop.eup %1311 }
 0x955   :  { %v1314_v8 = vpop.eup %1313  ;;  %v1009_v9 = vmul.f32 %v1312_v4, %v993_v56 }
 0x956   :  { %v1008_v11 = vmul.f32 %v1314_v8, %v992_v57 }
 0x957   :  { %v1015_v12 = vmul.f32 %v1058_v6, %v1009_v9 }
 0x958   :  { %v1014_v13 = vmul.f32 %v1058_v6, %v1008_v11 }
 0x959   :  { %v1021_v14 = vadd.f32 %v1059_v10, %v1015_v12 }
 0x95a   :  { %v1020_v15 = vadd.f32 %v1059_v10, %v1014_v13 }
 0x95b   :  { %1023 = vst.msk [vmem:[%s1593_s6 + $0x8] sm:$0xff] %vm41_vm0, %v1021_v14 }
 0x95c   :  { %1022 = vst.msk [vmem:[%s1593_s6] sm:$0xff] %vm41_vm0, %v1020_v15 }

</bundles_post_ra>
